<compile_context>
chip_gen: v7x
topology: tpu7x:2x2x1
jax: 0.10.0
libtpu: 0.0.40
codegen_flags: <defaults>
</compile_context>

<pallas_src>
import jax
import jax.numpy as jnp
from jax.experimental import pallas as pl
from jax.experimental.pallas import tpu as pltpu


def _logreg_kernel(x_ref, params_ref, o_ref):
    # x_ref:      (2, TB)  VMEM  -- features on sublanes, batch on lanes
    # params_ref: (3,)     SMEM  -- [w0, w1, b] scalars
    # o_ref:      (1, TB)  VMEM  -- lane-dense output tile
    w0 = params_ref[0]
    w1 = params_ref[1]
    bias = params_ref[2]
    x0 = x_ref[0:1, :].astype(jnp.float32)        # (1, TB)
    x1 = x_ref[1:2, :].astype(jnp.float32)        # (1, TB)
    z = x0 * w0 + x1 * w1 + bias                  # VPU fused mul-adds
    o_ref[...] = jax.nn.sigmoid(z).astype(o_ref.dtype)  # EUP transcendental


def logistic_regression_forward(x, w, b, *, tile_b=None):
    """x: [B, 2], w: [1, 2] (PyTorch nn.Linear layout), b: [1] -> [B] float32."""
    batch, feat = x.shape
    assert feat == 2, "LogisticRegression spec has in_features=2"

    # Lane-axis tile: multiple of 128; bigger tiles once batch is realistic.
    if tile_b is None:
        tile_b = 128 if batch <= 128 else 512
    n_tiles = pl.cdiv(batch, tile_b)
    b_padded = n_tiles * tile_b

    # Batch on lanes: [2, B_padded]; padded tail produces sigmoid(b), sliced off.
    xt = jnp.transpose(x.astype(jnp.float32))     # (2, B)
    if b_padded != batch:
        xt = jnp.pad(xt, ((0, 0), (0, b_padded - batch)))

    # Scalars on the scalar path (SMEM): [w0, w1, b].
    params = jnp.concatenate(
        [w.reshape(-1).astype(jnp.float32), b.reshape(-1).astype(jnp.float32)]
    )                                             # (3,)

    out = pl.pallas_call(
        _logreg_kernel,
        out_shape=jax.ShapeDtypeStruct((1, b_padded), jnp.float32),
        grid_spec=pltpu.PrefetchScalarGridSpec(
            num_scalar_prefetch=0,
            grid=(n_tiles,),
            in_specs=[
                pl.BlockSpec((2, tile_b), lambda i: (0, i)),
                pl.BlockSpec(memory_space=pltpu.MemorySpace.SMEM),
            ],
            out_specs=pl.BlockSpec((1, tile_b), lambda i: (0, i)),
        ),
        compiler_params=pltpu.CompilerParams(
            dimension_semantics=("parallel",),
        ),
    )(xt, params)

    # PyTorch: x.squeeze(-1) -> shape [B]
    return out[0, :batch]


if __name__ == "__main__":
    key = jax.random.PRNGKey(0)
    kx, kw, kb = jax.random.split(key, 3)

    batch = 8
    in_features = 2

    # Deterministic synthetic parameters (shapes from nn.Linear(2, 1)).
    x = jax.random.normal(kx, (batch, in_features), dtype=jnp.float32)
    w = jax.random.normal(kw, (1, in_features), dtype=jnp.float32) * 0.5
    b = jax.random.normal(kb, (1,), dtype=jnp.float32) * 0.1

    y = logistic_regression_forward(x, w, b)
    y = jax.block_until_ready(y)

    # Reference check against plain JAX.
    y_ref = jax.nn.sigmoid(x @ w.T + b[None, :])[:, 0]
    assert y.shape == (batch,)
    assert jnp.allclose(y, y_ref, atol=1e-5), (y, y_ref)

    print("KERNEL_OK")
</pallas_src>

<mosaic_0001>
module attributes {stable_mosaic.version = 11 : i64} {
  func.func @_logreg_kernel(%arg0: i32, %arg1: memref<2x128xf32, #tpu.memory_space<vmem>>, %arg2: memref<3xf32, #tpu.memory_space<smem>>, %arg3: memref<1x128xf32, #tpu.memory_space<vmem>>) attributes {dimension_semantics = [#tpu.dimension_semantics<parallel>], iteration_bounds = array<i64: 1>, scalar_prefetch = 0 : i64, scratch_operands = 0 : i64, tpu.core_type = #tpu.core_type<tc>, window_params = [{transform_indices = @transform_0, window_bounds = array<i64: 2, 128>}, {transform_indices = @transform_1, window_bounds = array<i64: 3>}, {transform_indices = @transform_2, window_bounds = array<i64: 1, 128>}]} {
    %c0 = arith.constant 0 : index
    %0 = memref.load %arg2[%c0] : memref<3xf32, #tpu.memory_space<smem>>
    %c1 = arith.constant 1 : index
    %1 = memref.load %arg2[%c1] : memref<3xf32, #tpu.memory_space<smem>>
    %c2 = arith.constant 2 : index
    %2 = memref.load %arg2[%c2] : memref<3xf32, #tpu.memory_space<smem>>
    %c0_0 = arith.constant 0 : index
    %c0_1 = arith.constant 0 : index
    %3 = vector.load %arg1[%c0_0, %c0_1] : memref<2x128xf32, #tpu.memory_space<vmem>>, vector<1x128xf32>
    %c1_2 = arith.constant 1 : index
    %c0_3 = arith.constant 0 : index
    %4 = vector.load %arg1[%c1_2, %c0_3] : memref<2x128xf32, #tpu.memory_space<vmem>>, vector<1x128xf32>
    %5 = vector.broadcast %0 : f32 to vector<1x128xf32>
    %6 = arith.mulf %3, %5 : vector<1x128xf32>
    %7 = vector.broadcast %1 : f32 to vector<1x128xf32>
    %8 = arith.mulf %4, %7 : vector<1x128xf32>
    %9 = arith.addf %6, %8 : vector<1x128xf32>
    %10 = vector.broadcast %2 : f32 to vector<1x128xf32>
    %11 = arith.addf %9, %10 : vector<1x128xf32>
    %12 = arith.negf %11 : vector<1x128xf32>
    %13 = math.exp %12 : vector<1x128xf32>
    %cst = arith.constant 1.000000e+00 : f32
    %14 = vector.broadcast %cst : f32 to vector<1x128xf32>
    %15 = arith.addf %14, %13 : vector<1x128xf32>
    %16 = arith.divf %14, %15 : vector<1x128xf32>
    %c0_4 = arith.constant 0 : index
    %c0_5 = arith.constant 0 : index
    %17 = vector.load %arg3[%c0_4, %c0_5] : memref<1x128xf32, #tpu.memory_space<vmem>>, vector<1x128xf32>
    tpu.vector_store %arg3[%c0_4, %c0_5], %16 {strides = array<i32>} : memref<1x128xf32, #tpu.memory_space<vmem>>, vector<1x128xf32>,
    return
  }
  func.func @transform_0(%arg0: i32) -> (i32, i32) {
    %c0_i32 = arith.constant 0 : i32
    %c0_i32_0 = arith.constant 0 : i32
    return %c0_i32, %arg0 : i32, i32
  }
  func.func @transform_1(%arg0: i32) -> i32 {
    %c0_i32 = arith.constant 0 : i32
    %c0_i32_0 = arith.constant 0 : i32
    return %c0_i32 : i32
  }
  func.func @transform_2(%arg0: i32) -> (i32, i32) {
    %c0_i32 = arith.constant 0 : i32
    %c0_i32_0 = arith.constant 0 : i32
    return %c0_i32, %arg0 : i32, i32
  }
}

</mosaic_0001>

<bundles_post_ra>
// kernel: tpu_custom_call.1
= control target key start
LH: loop header
LB: loop body
LE: loop exit
PB: predicated region body
PF: predicated region fallthrough
CT: control target
= control target key end

     0   :  { %7 = vsyncpa [#allocation3], 0  ;;  %s189_s0 = inlined_call_operand.hbm [shape: f32[2,128], index: 0, kind: input, shape index: {}]   ;;  %s190_s1 = inlined_call_operand.vmem [shape: f32[3], index: 1, kind: input, shape index: {}]   ;;  %s191_s2 = inlined_call_operand.hbm [shape: f32[1,128], index: 2, kind: output, shape index: {}]  }
   0x1   :  { %8 = vsyncpa [#allocation5], 0 }
   0x2   :  { %9 = vsyncpa [#allocation4], 0  ;;  %s26_s11 = sshll.u32 %s190_s1, 4  ;;  %s144_s12 = smov [#allocation2]   ;;  %s27_s11 = int_to_ptr.vmem [resolvable:$true] %s26_s11 }
   0x3   :  { %s16_s13 = sshll.u32 %s144_s12, 4  ;;  %s82_s16 = scalar_lea.hbm %s189_s0, 32  ;;  %s17_s13 = int_to_ptr.vmem [resolvable:$true] %s16_s13 }
   0x4   :  { %p83_p0 = scmp.ne.s32.totalorder %s189_s0, %s82_s16  ;;  %p86_p1 = scmp.lt.u32.totalorder %s82_s16, %s189_s0 }
   0x6   :  { %p88_p2 = pnand %p86_p1, %p83_p0 }
   0x8   :  { %91 = shalt.err (!%p88_p2)
}
   0x9   :  { %s92_s21 = scalar_lea.vmem %s17_s13, 32  ;;  %p97_p4 = scmp.lt.s32.totalorder %s17_s13, %s17_s13 }
   0xa   :  { %p93_p3 = scmp.ne.s32.totalorder %s17_s13, %s92_s21  ;;  %p98_p5 = scmp.lt.s32.totalorder %s92_s21, %s92_s21 }
   0xc   :  { %p99_p6 = por %p98_p5, %p97_p4 }
   0xe   :  { %p100_p7 = pnand %p99_p6, %p93_p3 }
  0x10   :  { %103 = shalt.err (!%p100_p7)
}
  0x11   :  { %19 = dma.hbm_to_vmem [thread:$0]  %s189_s0, 32, %s17_s13, [#allocation3]  }
  0x12   :  { %s104_s23 = scalar_lea.vmem %s27_s11, 16  ;;  %p109_p9 = scmp.lt.s32.totalorder %s27_s11, %s27_s11 }
  0x13   :  { %p105_p8 = scmp.ne.s32.totalorder %s27_s11, %s104_s23  ;;  %p110_p10 = scmp.lt.s32.totalorder %s104_s23, %s104_s23 }
  0x15   :  { %p111_p11 = por %p110_p10, %p109_p9 }
  0x17   :  { %p112_p12 = pnand %p111_p11, %p105_p8 }
  0x19   :  { %115 = shalt.err (!%p112_p12)
}
  0x1a   :  { %s145_s24 = smov [#allocation6]  }
  0x1b   :  { %29 = dma.vmem_to_smem %s27_s11, 16, %s145_s24, [#allocation5]  }
  0x1c   :  { %138 = dma.done.wait [#allocation3], 32  }
  0x1d   :  { %139 = vsyncadd [#allocation3], 4294967264 }
  0x1e   :  { %140 = dma.done.wait [#allocation5], 16  }
  0x1f   :  { %141 = vsyncadd [#allocation5], 4294967280 }
  0x20   :  { %36 = sfence }
  0x21   :  { %s37_s25 = sld [smem:[#allocation6]]  ;;  %s72_s26 = sld [smem:[#allocation6 + $0x1]]  ;;  %v40_v0 = vld [vmem:[#allocation2] sm:$0x1]  ;;  %v41_v1 = vld [vmem:[#allocation2 + $0x1] sm:$0x1] }
  0x22   :  { %s73_s27 = sld [smem:[#allocation6 + $0x2]]  ;;  %s146_s0 = smov [#allocation7]  }
  0x23   :  { %s62_s28 = sshll.u32 %s146_s0, 4  ;;  %s63_s28 = int_to_ptr.vmem [resolvable:$true] %s62_s28 }
  0x24   :  { %s116_s29 = scalar_lea.vmem %s63_s28, 16  ;;  %s120_s30 = scalar_lea.vmem %s63_s28, 32 }
  0x25   :  { %p117_p13 = scmp.ne.s32.totalorder %s63_s28, %s116_s29  ;;  %p121_p0 = scmp.lt.s32.totalorder %s63_s28, %s63_s28 }
  0x26   :  { %p122_p1 = scmp.lt.s32.totalorder %s120_s30, %s116_s29 }
  0x27   :  { %v42_v2 = vstv %s37_s25  ;;  %v44_v3 = vstv %s72_s26 }
  0x28   :  { %v43_v4 = vmul.f32 %v42_v2, %v40_v0  ;;  %v45_v5 = vmul.f32 %v44_v3, %v41_v1  ;;  %v47_v6 = vstv %s73_s27  ;;  %p123_p2 = por %p122_p1, %p121_p0 }
  0x2a   :  { %v46_v7 = vadd.f32 %v45_v5, %v43_v4  ;;  %p124_p3 = pnand %p123_p2, %p117_p13 }
  0x2c   :  { %v48_v8 = vadd.f32 %v47_v6, %v46_v7 }
  0x2e   :  { %v74_v9 = vmul.f32 -1.442695, %v48_v8 }
  0x30   :  { %78 = vpow2.f32 %v74_v9 }
  0x3a   :  { %v79_v10 = vpop.eup %78 }
  0x3b   :  { %v52_v11 = vadd.f32 1.0, %v79_v10 }
  0x3d   :  { %80 = vrcp.f32 %v52_v11 }
  0x47   :  { %v81_v12 = vpop.eup %80 }
  0x48   :  { %55 = vst [vmem:[#allocation7] sm:$0x1] %v81_v12 }
  0x49   :  { %127 = shalt.err (!%p124_p3)
}
  0x4a   :  { %s128_s5 = scalar_lea.hbm %s191_s2, 16 }
  0x4b   :  { %p129_p4 = scmp.ne.s32.totalorder %s191_s2, %s128_s5  ;;  %p132_p5 = scmp.lt.u32.totalorder %s128_s5, %s191_s2 }
  0x4d   :  { %p134_p6 = pnand %p132_p5, %p129_p4 }
  0x4f   :  { %137 = shalt.err (!%p134_p6)
}
  0x50   :  { %65 = dma.vmem_to_hbm [thread:$0]  %s63_s28, 16, %s191_s2, [#allocation4]  }
  0x51   :  { %142 = dma.done.wait [#allocation4], 16  }
  0x52   :  { %143 = vsyncadd [#allocation4], 4294967280 }
  0x53   :  { %69 = vsyncpa [#allocation3], 1 }
  0x54   :  { %70 = vsyncpa [#allocation4], 1 }
  0x55   :  { %71 = vsyncpa [#allocation5], 1 }

</bundles_post_ra>
